<compile_context>
chip_gen: v7x
topology: tpu7x:2x2x1
jax: 0.10.0
libtpu: 0.0.40
codegen_flags: <defaults>
</compile_context>

<pallas_src>
import jax
import jax.numpy as jnp
from jax.experimental import pallas as pl
from jax.experimental.pallas import tpu as pltpu


# ----------------------------- Pallas kernel --------------------------------

def dlrm_fused_kernel(a_ref, w_ref, bias_ref, out_ref):
    # a_ref:    [K, tb]  bf16   transposed batch tile of packed inputs
    # w_ref:    [K, 1]   f32    fully folded weights (resident)
    # bias_ref: [1]      f32    folded scalar bias (SMEM)
    # out_ref:  [1, tb]  f32    lane-dense predictions
    a = a_ref[...].astype(jnp.float32)                       # upcast, f32 math
    prod = a * w_ref[...]                                     # row-scale (VPU)
    logit = jnp.sum(prod, axis=0, keepdims=True) + bias_ref[0]  # sublane reduce (XLU)
    out_ref[...] = jax.nn.sigmoid(logit)


def dlrm_forward(a_all_t, w_fold, bias, *, tb=256):
    """a_all_t: [K_all, B] bf16, w_fold: [K_all, 1] f32, bias: [1] f32 -> pred [B] f32."""
    K, B = a_all_t.shape
    tb = min(tb, B)
    assert B % tb == 0, "batch must be divisible by the batch tile"
    assert tb % 128 == 0 or tb == B, "lane-dense tiling wants tb % 128 == 0"
    out = pl.pallas_call(
        dlrm_fused_kernel,
        out_shape=jax.ShapeDtypeStruct((1, B), jnp.float32),
        grid=(B // tb,),
        in_specs=[
            pl.BlockSpec((K, tb), lambda i: (0, i)),          # streamed input tile
            pl.BlockSpec((K, 1), lambda i: (0, 0)),           # folded weights (resident)
            pl.BlockSpec(memory_space=pltpu.MemorySpace.SMEM),  # scalar bias in SMEM
        ],
        out_specs=pl.BlockSpec((1, tb), lambda i: (0, i)),    # lane-dense output row
        compiler_params=pltpu.CompilerParams(
            dimension_semantics=("parallel",),                # batch tiles are independent
        ),
    )(a_all_t, w_fold, bias)
    return out[0]


# ----------------------------- wrapper glue ----------------------------------

def fold_params(wd, bd, e0, e1, f0, f1, wo, bo):
    """Fold the over-arch + final mean into the per-block weights:
    pred = sigmoid(a_all @ w_fold + bias)."""
    w_vec = jnp.mean(wo, axis=1, keepdims=True)               # [C, 1]
    parts, off = [], 0
    for m in (wd, e0, e1, f0, f1):
        c = m.shape[1]
        parts.append(m @ w_vec[off:off + c])                  # [rows_block, 1]
        off += c
    w_fold = jnp.concatenate(parts, axis=0).astype(jnp.float32)   # [K_all, 1]
    bias = (bd @ w_vec[: bd.shape[1]]).reshape(()) + jnp.mean(bo)
    return w_fold, jnp.reshape(bias, (1,)).astype(jnp.float32)


def bag_matrix(ids, weights, num_embeddings):
    """Scatter (weighted) bag membership into a dense [B, num_embeddings] matrix."""
    B, _ = ids.shape
    A = jnp.zeros((B, num_embeddings), jnp.float32)
    return A.at[jnp.arange(B)[:, None], ids].add(weights)


def ref_forward(x, wd, bd, a0, e0, a1, e1, aw0, f0, aw1, f1, wo, bo):
    """Original (unfolded) forward semantics, pure JAX f32."""
    dense_r = x @ wd + bd
    s0, s1 = a0 @ e0, a1 @ e1
    sw0, sw1 = aw0 @ f0, aw1 @ f1
    concat = jnp.concatenate([dense_r, s0, s1, sw0, sw1], axis=1)
    over_r = concat @ wo + bo
    return jax.nn.sigmoid(jnp.mean(over_r, axis=1))


if __name__ == "__main__":
    key = jax.random.PRNGKey(0)

    # Small, deterministic shapes consistent with the module's forward.
    B = 512                    # batch (2 lane-dense tiles of 256)
    TB = 256                   # batch tile per grid step
    F_IN = 32                  # num_float_features
    D_DENSE = 32               # dense_out_features
    D_OVER = 32                # over_out_features
    N0, D0 = 96, 16            # table_0:  num_embeddings, embedding_dim
    N1, D1 = 64, 16            # table_1
    M0, E0 = 96, 16            # weighted_table_0
    M1, E1 = 64, 16            # weighted_table_1
    L = 3                      # ids per bag
    C = D_DENSE + D0 + D1 + E0 + E1      # concat width fed to `over` (= 96)

    ks = jax.random.split(key, 16)

    # Dense inputs and parameters (Linear weights stored as [in, out]).
    x = jax.random.normal(ks[0], (B, F_IN), jnp.float32)
    wd = jax.random.uniform(ks[1], (F_IN, D_DENSE), jnp.float32, -1.0, 1.0) / jnp.sqrt(F_IN)
    bd = jax.random.uniform(ks[2], (1, D_DENSE), jnp.float32, -1.0, 1.0) / jnp.sqrt(F_IN)
    wo = jax.random.uniform(ks[3], (C, D_OVER), jnp.float32, -1.0, 1.0) / jnp.sqrt(C)
    bo = jax.random.uniform(ks[4], (1, D_OVER), jnp.float32, -1.0, 1.0) / jnp.sqrt(C)

    # Embedding tables.
    e0 = jax.random.normal(ks[5], (N0, D0), jnp.float32)
    e1 = jax.random.normal(ks[6], (N1, D1), jnp.float32)
    f0 = jax.random.normal(ks[7], (M0, E0), jnp.float32)
    f1 = jax.random.normal(ks[8], (M1, E1), jnp.float32)

    # Sparse features: id-list (unit weights) and id-score (per-id weights).
    ids0 = jax.random.randint(ks[9], (B, L), 0, N0)
    ids1 = jax.random.randint(ks[10], (B, L), 0, N1)
    wids0 = jax.random.randint(ks[11], (B, L), 0, M0)
    wids1 = jax.random.randint(ks[12], (B, L), 0, M1)
    wts0 = jax.random.uniform(ks[13], (B, L), jnp.float32, 0.0, 1.0)
    wts1 = jax.random.uniform(ks[14], (B, L), jnp.float32, 0.0, 1.0)

    # Dense bag matrices (glue; the pooling itself is folded into the kernel pass).
    a0 = bag_matrix(ids0, jnp.ones((B, L), jnp.float32), N0)
    a1 = bag_matrix(ids1, jnp.ones((B, L), jnp.float32), N1)
    aw0 = bag_matrix(wids0, wts0, M0)
    aw1 = bag_matrix(wids1, wts1, M1)

    # Wrapper-side packing: one transposed bf16 input slab + fully folded weights.
    a_all = jnp.concatenate([x, a0, a1, aw0, aw1], axis=1)        # [B, 352] f32
    a_all_t = a_all.T.astype(jnp.bfloat16)                         # [352, B] bf16 (streamed)
    w_fold, bias = fold_params(wd, bd, e0, e1, f0, f1, wo, bo)     # [352, 1], [1]

    pred = jax.block_until_ready(dlrm_forward(a_all_t, w_fold, bias, tb=TB))
    pred_ref = ref_forward(x, wd, bd, a0, e0, a1, e1, aw0, f0, aw1, f1, wo, bo)

    assert pred.shape == (B,)
    # bf16 cast of the streamed operand + fp reassociation of the folds keep the
    # sigmoid output within a few 1e-3 of the unfolded f32 reference.
    assert jnp.allclose(pred, pred_ref, atol=5e-3, rtol=5e-3), (pred, pred_ref)

    # TODO(synk): training-mode BCE loss branch is not implemented (eval-mode forward only).
    print("KERNEL_OK")
</pallas_src>

<mosaic_0001>
module attributes {stable_mosaic.version = 11 : i64} {
  func.func @dlrm_fused_kernel(%arg0: i32, %arg1: memref<352x256xbf16, #tpu.memory_space<vmem>>, %arg2: memref<352x1xf32, #tpu.memory_space<vmem>>, %arg3: memref<1xf32, #tpu.memory_space<smem>>, %arg4: memref<1x256xf32, #tpu.memory_space<vmem>>) attributes {dimension_semantics = [#tpu.dimension_semantics<parallel>], iteration_bounds = array<i64: 2>, scalar_prefetch = 0 : i64, scratch_operands = 0 : i64, tpu.core_type = #tpu.core_type<tc>, window_params = [{transform_indices = @transform_0, window_bounds = array<i64: 352, 256>}, {pipeline_mode = #tpu.pipeline_mode<synchronous>, transform_indices = @transform_1, window_bounds = array<i64: 352, 1>}, {transform_indices = @transform_2, window_bounds = array<i64: 1>}, {transform_indices = @transform_3, window_bounds = array<i64: 1, 256>}]} {
    %c0 = arith.constant 0 : index
    %c0_0 = arith.constant 0 : index
    %0 = vector.load %arg1[%c0, %c0_0] : memref<352x256xbf16, #tpu.memory_space<vmem>>, vector<352x256xbf16>
    %1 = arith.extf %0 : vector<352x256xbf16> to vector<352x256xf32>
    %c0_1 = arith.constant 0 : index
    %c0_2 = arith.constant 0 : index
    %2 = vector.load %arg2[%c0_1, %c0_2] : memref<352x1xf32, #tpu.memory_space<vmem>>, vector<352x1xf32>
    %3 = vector.broadcast %2 : vector<352x1xf32> to vector<352x256xf32>
    %4 = arith.mulf %1, %3 : vector<352x256xf32>
    %cst = arith.constant dense<0.000000e+00> : vector<256xf32>
    %5 = vector.multi_reduction <add>, %4, %cst [0] : vector<352x256xf32> to vector<256xf32>
    %6 = vector.shape_cast %5 : vector<256xf32> to vector<1x256xf32>
    %c0_3 = arith.constant 0 : index
    %7 = memref.load %arg3[%c0_3] : memref<1xf32, #tpu.memory_space<smem>>
    %8 = vector.broadcast %7 : f32 to vector<1x256xf32>
    %9 = arith.addf %6, %8 : vector<1x256xf32>
    %10 = arith.negf %9 : vector<1x256xf32>
    %11 = math.exp %10 : vector<1x256xf32>
    %cst_4 = arith.constant 1.000000e+00 : f32
    %12 = vector.broadcast %cst_4 : f32 to vector<1x256xf32>
    %13 = arith.addf %12, %11 : vector<1x256xf32>
    %14 = arith.divf %12, %13 : vector<1x256xf32>
    %c0_5 = arith.constant 0 : index
    %c0_6 = arith.constant 0 : index
    %15 = vector.load %arg4[%c0_5, %c0_6] : memref<1x256xf32, #tpu.memory_space<vmem>>, vector<1x256xf32>
    tpu.vector_store %arg4[%c0_5, %c0_6], %14 {strides = array<i32>} : memref<1x256xf32, #tpu.memory_space<vmem>>, vector<1x256xf32>,
    return
  }
  func.func @transform_0(%arg0: i32) -> (i32, i32) {
    %c0_i32 = arith.constant 0 : i32
    %c0_i32_0 = arith.constant 0 : i32
    return %c0_i32, %arg0 : i32, i32
  }
  func.func @transform_1(%arg0: i32) -> (i32, i32) {
    %c0_i32 = arith.constant 0 : i32
    %c0_i32_0 = arith.constant 0 : i32
    %c0_i32_1 = arith.constant 0 : i32
    return %c0_i32, %c0_i32_0 : i32, i32
  }
  func.func @transform_2(%arg0: i32) -> i32 {
    %c0_i32 = arith.constant 0 : i32
    %c0_i32_0 = arith.constant 0 : i32
    return %c0_i32 : i32
  }
  func.func @transform_3(%arg0: i32) -> (i32, i32) {
    %c0_i32 = arith.constant 0 : i32
    %c0_i32_0 = arith.constant 0 : i32
    return %c0_i32, %arg0 : i32, i32
  }
}

</mosaic_0001>

<bundles_post_ra>
// kernel: tpu_custom_call.1
= control target key start
LH: loop header
LB: loop body
LE: loop exit
PB: predicated region body
PF: predicated region fallthrough
CT: control target
= control target key end

     0   :  { %s1440_s0 = inlined_call_operand.hbm [shape: bf16[352,512], index: 0, kind: input, shape index: {}]   ;;  %s1441_s1 = inlined_call_operand.vmem [shape: f32[352,1], index: 1, kind: input, shape index: {}]   ;;  %s1442_s2 = inlined_call_operand.<no memory space> [shape: f32[1], index: 2, kind: input, shape index: {}]   ;;  %s1443_s3 = inlined_call_operand.hbm [shape: f32[1,512], index: 3, kind: output, shape index: {}]  }
   0x1   :  { %8 = sst [smem:[#allocation2]] %s1442_s2 }
   0x2   :  { %9 = vsyncpa [#allocation4], 0 }
   0x3   :  { %11 = vsyncpa [#allocation4 + $0x1], 0 }
   0x4   :  { %12 = vsyncpa [#allocation5], 0 }
   0x5   :  { %14 = vsyncpa [#allocation5 + $0x1], 0  ;;  %s1105_s14 = smov 0   ;;  %s1107_s15 = smov 0  }
   0x6   :  { %s1109_s16 = smov 0   ;;  %s1111_s17 = smov 0  }
   0x7 LB: > { %s1126_s2 = sadd.s32 4294967295, %s1073_s17   ;;  %s898_s18 = sadd.s32 4294967294, %s1073_s17   ;;  %s1073_s17 = sphi %s1111_s17, %s1456_s17   ;;  %s1069_s16 = sphi %s1109_s16, %s1455_s16   ;;  %s1065_s15 = sphi %s1107_s15, %s1454_s15   ;;  %s1061_s14 = sphi %s1105_s14, %s1453_s14  }
   0x8   : > { %s1130_s19 = sadd.s32 1, %s1073_s17   ;;  %s27_s20 = sadd.s32 1, %s1069_s16 }
   0x9   : > { %s24_s21 = ssub.s32 %s1073_s17, %s1130_s19  ;;  %p34_p0 = scmp.ne.s32.totalorder %s1069_s16, %s1065_s15 }
   0xa   : > { %p25_p1 = scmp.eq.s32.totalorder %s24_s21, 0  ;;  %p35_p2 = scmp.eq.s32.totalorder %s1073_s17, 0 }
   0xb   : > { %p40_p3 = scmp.ne.s32.totalorder %s1065_s15, %s1061_s14  ;;  %p41_p4 = scmp.eq.s32.totalorder %s1126_s2, 0 }
   0xc   : > { %s1142_s22 = scalar_select %p25_p1, %s1069_s16, %s27_s20  }
   0xd   : > { %p36_p5 = por %p35_p2, %p34_p0  ;;  %p1144_p6 = por %p41_p4, %p40_p3 }
   0xe   : > { %p106_p7 = scmp.eq.s32.totalorder %s1126_s2, 1  ;;  %p112_p8 = scmp.eq.s32.totalorder %s898_s18, 1 }
   0xf   : > { %p928_p10 = scmp.lt.s32.totalorder %s1073_s17, 2  ;;  %s138_s26 = sand.u32 1, %s1069_s16  }
  0x10   : > { %p1151_p11 = por %p106_p7, %p34_p0  ;;  %p1155_p12 = por %p112_p8, %p40_p3 }
  0x11   : > { %s912_s27 = sshll.u32 %s1073_s17, 7  ;;  %s914_s28 = smul.u32 352, %s138_s26 }
  0x12   : > { %s1446_s24 = scalar_select %p1151_p11, 1, 0 }
  0x13   : > { %s1447_s25 = scalar_select %p1155_p12, 1, 0 }
  0x14   : > { %s1164_s4 = scalar_lea.hbm %s1440_s0, %s912_s27  ;;  %p1166_p13 = pnand %p928_p10, %p36_p5 }
  0x15   : > { %s142_s6 = scalar_lea.vmem [#allocation3], %s914_s28  ;;  %s1173_s8 = scalar_lea.sflag [#allocation4], %s138_s26 }
  0x16   : > { %s149_s7 = sshll.u32 %s142_s6, 4  ;;  %s977_s9 = scalar_lea.hbm %s1164_s4, 5632  ;;  %s1170_s7 = int_to_ptr.vmem [resolvable:$true] %s149_s7 }
  0x17   : > { %p978_p1 = scmp.ne.s32.totalorder %s1164_s4, %s977_s9  ;;  %p979_p2 = pneg %p1166_p13 }
  0x18   : > { %s982_s12 = scalar_lea.hbm %s1440_s0, 11264  ;;  %p983_p5 = scmp.lt.u32.totalorder %s1164_s4, %s1440_s0 }
  0x19   : > { %p980_p3 = pnand %p979_p2, %p978_p1  ;;  %p984_p7 = scmp.lt.u32.totalorder %s982_s12, %s977_s9 }
  0x1a   : > { %p986_p10 = scmp.lt.u32.totalorder %s977_s9, %s1164_s4 }
  0x1b   : > { %p981_p4 = pneg %p980_p3  ;;  %p985_p8 = por %p984_p7, %p983_p5 }
  0x1d   : > { %p987_p9 = por %p986_p10, %p985_p8 }
  0x1f   : > { %p988_p0 = pnand %p987_p9, %p981_p4 }
  0x21   : > { %991 = shalt.err (!%p988_p0)
}
  0x22   : > { %s992_s20 = scalar_lea.vmem %s1170_s7, 5632  ;;  %s1075_s21 = smov [#allocation3]  }
  0x23   : > { %p993_p1 = scmp.ne.s32.totalorder %s1170_s7, %s992_s20  ;;  %s997_s26 = sshll.u32 %s1075_s21, 4  ;;  %s998_s26 = int_to_ptr.vmem [resolvable:$false] %s997_s26 }
  0x24   : > { %s999_s27 = scalar_lea.vmem %s998_s26, 11264  ;;  %p1000_p11 = scmp.lt.s32.totalorder %s1170_s7, %s998_s26 }
  0x25   : > { %p995_p3 = pnand %p993_p1, %p979_p2  ;;  %p1001_p5 = scmp.lt.s32.totalorder %s999_s27, %s992_s20 }
  0x27   : > { %p996_p12 = pneg %p995_p3  ;;  %p1002_p7 = por %p1001_p5, %p1000_p11 }
  0x29   : > { %p1003_p8 = pnand %p1002_p7, %p996_p12 }
  0x2b   : > { %1006 = shalt.err (!%p1003_p8)
}
  0x2c   : > { %s1076_s28 = smov 256   ;;  %s1077_s29 = smov 128  }
  0x2d   : > { %s1078_s30 = smov 8   ;;  %p157_p9 = scmp.lt.s32.totalorder %s1073_s17, 3 }
  0x2e   : > { %923 = dma.hbm_to_vmem [thread:$0]  (!%p1166_p13), %s1164_s4, 5632, %s1170_s7, %s1173_s8, %s1076_s28, %s1077_s29, %s1078_s30  }
  0x2f   : > { %p1449_p0 = scmp.ge.s32.totalorder %s1073_s17, 1 }
  0x31   : > { %p158_p2 = pnand %p1449_p0, %p157_p9 }
  0x32   : > { %s1205_s6 = sand.u32 (!%p158_p2), 1, %s1065_s15  }
  0x33   : > { %161 = sbr.rel (%p158_p2) target bundleno = 342 (0x156), region = 32  ;;  %s164_s10 = scalar_lea.sflag (!%p158_p2), [#allocation4], %s1205_s6 }
  0x34   : > { %s915_s9 = smul.u32 (!%p158_p2), 352, %s1205_s6 }
  0x36   : > { %s1209_s11 = scalar_lea.vmem (!%p158_p2), [#allocation3], %s915_s9 }
  0x3a   : > { %1052 = dma.done.wait (%p1144_p6), %s164_s10, 5632  }
  0x3b   : > { %1054 = vsyncadd (%p1144_p6), %s164_s10, 4294961664  ;;  %v1079_v0 = vmov 0   ;;  %v326_v1 = vld [vmem:[%s1441_s1 + $0x10] sm:$0xff]  ;;  %v324_v2 = vld [vmem:[%s1441_s1] sm:$0xff]  ;;  %s904_s8 = sshll.u32 %s1205_s6, 1  ;;  %s913_s12 = sshll.u32 %s1126_s2, 5 }
  0x3c   : > { %968 = vset.pattern.permute.xlu1 %v1079_v0  ;;  %967 = vset.pattern.permute.xlu0 %v1079_v0  ;;  %v327_v3 = vld [vmem:[%s1441_s1 + $0x18] sm:$0xff]  ;;  %v325_v4 = vld [vmem:[%s1441_s1 + $0x8] sm:$0xff]  ;;  %v328_v6 = vld [vmem:[%s1441_s1 + $0x20] sm:$0xff]  ;;  %s189_s13 = scalar_lea.vmem [#allocation6], %s904_s8  ;;  %s1396_s21 = scalar_lea.hbm %s1443_s3, %s913_s12 }
  0x3d   : > { %380 = vperm.xlu1 %968, %v326_v1   ;;  %370 = vperm.xlu0 %967, %v324_v2   ;;  %v329_v5 = vld [vmem:[%s1441_s1 + $0x28] sm:$0xff]  ;;  %v331_v7 = vld [vmem:[%s1441_s1 + $0x38] sm:$0xff]  ;;  %v330_v8 = vld [vmem:[%s1441_s1 + $0x30] sm:$0xff]  ;;  %s828_s18 = sshll.u32 %s189_s13, 4  ;;  %s814_s26 = scalar_lea.sflag [#allocation5], %s1205_s6  ;;  %s1398_s18 = int_to_ptr.vmem [resolvable:$true] %s828_s18 }
  0x3e   : > { %v333_v9 = vld [vmem:[%s1441_s1 + $0x48] sm:$0xff]  ;;  %v332_v10 = vld [vmem:[%s1441_s1 + $0x40] sm:$0xff]  ;;  %v335_v11 = vld [vmem:[%s1441_s1 + $0x58] sm:$0xff]  ;;  %s1007_s27 = scalar_lea.vmem %s1398_s18, 32  ;;  %p1450_p11 = scmp.ne.s32.totalorder %s1446_s24, 0 }
  0x3f   : > { %v334_v12 = vld [vmem:[%s1441_s1 + $0x50] sm:$0xff]  ;;  %v337_v13 = vld [vmem:[%s1441_s1 + $0x68] sm:$0xff]  ;;  %v336_v14 = vld [vmem:[%s1441_s1 + $0x60] sm:$0xff]  ;;  %p1008_p6 = scmp.ne.s32.totalorder %s1398_s18, %s1007_s27  ;;  %s1081_s2 = smov [#allocation6]  }
  0x40   : > { %v339_v15 = vld [vmem:[%s1441_s1 + $0x78] sm:$0xff]  ;;  %v338_v16 = vld [vmem:[%s1441_s1 + $0x70] sm:$0xff]  ;;  %v341_v17 = vld [vmem:[%s1441_s1 + $0x88] sm:$0xff]  ;;  %s1011_s28 = sshll.u32 %s1081_s2, 4  ;;  %s1012_s28 = int_to_ptr.vmem [resolvable:$false] %s1011_s28 }
  0x41   : > { %385 = vperm.xlu1 %968, %v327_v3   ;;  %375 = vperm.xlu0 %967, %v325_v4   ;;  %v340_v18 = vld [vmem:[%s1441_s1 + $0x80] sm:$0xff]  ;;  %v343_v19 = vld [vmem:[%s1441_s1 + $0x98] sm:$0xff]  ;;  %v342_v20 = vld [vmem:[%s1441_s1 + $0x90] sm:$0xff]  ;;  %p1009_p12 = pnand %p1008_p6, %p1450_p11  ;;  %s1013_s29 = scalar_lea.vmem %s1012_s28, 64 }
  0x42   : > { %v345_v21 = vld [vmem:[%s1441_s1 + $0xa8] sm:$0xff]  ;;  %v344_v22 = vld [vmem:[%s1441_s1 + $0xa0] sm:$0xff]  ;;  %v347_v23 = vld [vmem:[%s1441_s1 + $0xb8] sm:$0xff]  ;;  %p1014_p4 = scmp.lt.s32.totalorder %s1398_s18, %s1012_s28  ;;  %p1015_p10 = scmp.lt.s32.totalorder %s1013_s29, %s1007_s27 }
  0x43   : > { %v346_v24 = vld [vmem:[%s1441_s1 + $0xb0] sm:$0xff]  ;;  %v349_v25 = vld [vmem:[%s1441_s1 + $0xc8] sm:$0xff]  ;;  %v348_v26 = vld [vmem:[%s1441_s1 + $0xc0] sm:$0xff]  ;;  %p1010_p13 = pneg %p1009_p12 }
  0x44   : > { %v351_v27 = vld [vmem:[%s1441_s1 + $0xd8] sm:$0xff]  ;;  %v350_v28 = vld [vmem:[%s1441_s1 + $0xd0] sm:$0xff]  ;;  %v353_v29 = vld [vmem:[%s1441_s1 + $0xe8] sm:$0xff]  ;;  %p1016_p1 = por %p1015_p10, %p1014_p4 }
  0x45   : > { %395 = vperm.xlu1 %968, %v329_v5   ;;  %390 = vperm.xlu0 %967, %v328_v6   ;;  %v352_v30 = vld [vmem:[%s1441_s1 + $0xe0] sm:$0xff]  ;;  %v355_v31 = vld [vmem:[%s1441_s1 + $0xf8] sm:$0xff]  ;;  %v354_v32 = vld [vmem:[%s1441_s1 + $0xf0] sm:$0xff] }
  0x46   : > { %v357_v33 = vld [vmem:[%s1441_s1 + $0x108] sm:$0xff]  ;;  %v356_v34 = vld [vmem:[%s1441_s1 + $0x100] sm:$0xff]  ;;  %v359_v35 = vld [vmem:[%s1441_s1 + $0x118] sm:$0xff]  ;;  %p1017_p3 = pnand %p1016_p1, %p1010_p13 }
  0x47   : > { %v358_v36 = vld [vmem:[%s1441_s1 + $0x110] sm:$0xff]  ;;  %v361_v37 = vld [vmem:[%s1441_s1 + $0x128] sm:$0xff]  ;;  %v360_v38 = vld [vmem:[%s1441_s1 + $0x120] sm:$0xff] }
  0x48   : > { %v363_v39 = vld [vmem:[%s1441_s1 + $0x138] sm:$0xff]  ;;  %v362_v40 = vld [vmem:[%s1441_s1 + $0x130] sm:$0xff]  ;;  %v365_v41 = vld [vmem:[%s1441_s1 + $0x148] sm:$0xff] }
  0x49   : > { %405 = vperm.xlu1 %968, %v331_v7   ;;  %400 = vperm.xlu0 %967, %v330_v8   ;;  %v364_v42 = vld [vmem:[%s1441_s1 + $0x140] sm:$0xff]  ;;  %v367_v43 = vld [vmem:[%s1441_s1 + $0x158] sm:$0xff]  ;;  %v366_v44 = vld [vmem:[%s1441_s1 + $0x150] sm:$0xff] }
  0x4a   : > { %v192_v45 = vld [vmem:[%s1209_s11] sm:$0xff]  ;;  %v193_v46 = vld [vmem:[%s1209_s11 + $0x8] sm:$0xff]  ;;  %v194_v48 = vld [vmem:[%s1209_s11 + $0x10] sm:$0xff] }
  0x4b   : > { %v236_v50 = vunpack.c.l.bf16 %v192_v45  ;;  %v237_v51 = vunpack.c.h.bf16 %v192_v45  ;;  %v195_v52 = vld [vmem:[%s1209_s11 + $0x18] sm:$0xff]  ;;  %v238_v53 = vunpack.c.l.bf16 %v193_v46  ;;  %v239_v54 = vunpack.c.h.bf16 %v193_v46  ;;  %v196_v57 = vld [vmem:[%s1209_s11 + $0x20] sm:$0xff]  ;;  %v197_v2 = vld [vmem:[%s1209_s11 + $0x28] sm:$0xff] }
  0x4c   : > { %v240_v55 = vunpack.c.l.bf16 %v194_v48  ;;  %v241_v56 = vunpack.c.h.bf16 %v194_v48  ;;  %v242_v59 = vunpack.c.l.bf16 %v195_v52  ;;  %v243_v60 = vunpack.c.h.bf16 %v195_v52 }
  0x4d   : > { %415 = vperm.xlu1 %968, %v333_v9   ;;  %410 = vperm.xlu0 %967, %v332_v10   ;;  %v244_v3 = vunpack.c.l.bf16 %v196_v57  ;;  %v245_v4 = vunpack.c.h.bf16 %v196_v57  ;;  %v198_v9 = vld [vmem:[%s1209_s11 + $0x30] sm:$0xff]  ;;  %v204_v57 = vld [vmem:[%s1209_s11 + $0x60] sm:$0xff] }
  0x51   : > { %425 = vperm.xlu1 %968, %v335_v11   ;;  %420 = vperm.xlu0 %967, %v334_v12   ;;  %v246_v11 = vunpack.c.l.bf16 %v197_v2  ;;  %v247_v12 = vunpack.c.h.bf16 %v197_v2  ;;  %v205_v2 = vld [vmem:[%s1209_s11 + $0x68] sm:$0xff] }
  0x55   : > { %435 = vperm.xlu1 %968, %v337_v13   ;;  %430 = vperm.xlu0 %967, %v336_v14  }
  0x59   : > { %445 = vperm.xlu1 %968, %v339_v15   ;;  %440 = vperm.xlu0 %967, %v338_v16  }
  0x5d   : > { %455 = vperm.xlu1 %968, %v341_v17   ;;  %450 = vperm.xlu0 %967, %v340_v18   ;;  %v199_v18 = vld [vmem:[%s1209_s11 + $0x38] sm:$0xff] }
  0x61   : > { %465 = vperm.xlu1 %968, %v343_v19   ;;  %460 = vperm.xlu0 %967, %v342_v20   ;;  %v248_v19 = vunpack.c.l.bf16 %v198_v9  ;;  %v249_v20 = vunpack.c.h.bf16 %v198_v9  ;;  %v206_v9 = vld [vmem:[%s1209_s11 + $0x70] sm:$0xff] }
  0x65   : > { %475 = vperm.xlu1 %968, %v345_v21   ;;  %470 = vperm.xlu0 %967, %v344_v22  }
  0x69   : > { %485 = vperm.xlu1 %968, %v347_v23   ;;  %480 = vperm.xlu0 %967, %v346_v24  }
  0x6d   : > { %495 = vperm.xlu1 %968, %v349_v25   ;;  %490 = vperm.xlu0 %967, %v348_v26   ;;  %v200_v25 = vld [vmem:[%s1209_s11 + $0x40] sm:$0xff] }
  0x71   : > { %505 = vperm.xlu1 %968, %v351_v27   ;;  %500 = vperm.xlu0 %967, %v350_v28   ;;  %v250_v27 = vunpack.c.l.bf16 %v199_v18  ;;  %v251_v28 = vunpack.c.h.bf16 %v199_v18  ;;  %v207_v18 = vld [vmem:[%s1209_s11 + $0x78] sm:$0xff] }
  0x75   : > { %515 = vperm.xlu1 %968, %v353_v29   ;;  %510 = vperm.xlu0 %967, %v352_v30  }
  0x79   : > { %525 = vperm.xlu1 %968, %v355_v31   ;;  %520 = vperm.xlu0 %967, %v354_v32  }
  0x7d   : > { %535 = vperm.xlu1 %968, %v357_v33   ;;  %530 = vperm.xlu0 %967, %v356_v34   ;;  %v201_v34 = vld [vmem:[%s1209_s11 + $0x48] sm:$0xff] }
  0x81   : > { %545 = vperm.xlu1 %968, %v359_v35   ;;  %540 = vperm.xlu0 %967, %v358_v36   ;;  %v252_v35 = vunpack.c.l.bf16 %v200_v25  ;;  %v253_v36 = vunpack.c.h.bf16 %v200_v25  ;;  %v208_v25 = vld [vmem:[%s1209_s11 + $0x80] sm:$0xff] }
  0x85   : > { %555 = vperm.xlu1 %968, %v361_v37   ;;  %550 = vperm.xlu0 %967, %v360_v38  }
  0x89   : > { %565 = vperm.xlu1 %968, %v363_v39   ;;  %560 = vperm.xlu0 %967, %v362_v40  }
  0x8d   : > { %575 = vperm.xlu1 %968, %v365_v41   ;;  %570 = vperm.xlu0 %967, %v364_v42   ;;  %v202_v41 = vld [vmem:[%s1209_s11 + $0x50] sm:$0xff] }
  0x8e   : > { %v257_v52 = vunpack.c.h.bf16 %v202_v41 }
  0x91   : > { %585 = vperm.xlu1 %968, %v367_v43   ;;  %580 = vperm.xlu0 %967, %v366_v44   ;;  %v254_v43 = vunpack.c.l.bf16 %v201_v34  ;;  %v255_v44 = vunpack.c.h.bf16 %v201_v34  ;;  %v209_v34 = vld [vmem:[%s1209_s11 + $0x88] sm:$0xff] }
  0xbc   : > { %v381_v47 = vpop.permute.xlu1 %380  ;;  %v371_v49 = vpop.permute.xlu0 %370 }
  0xbd   : > { %v588_v62 = vmul.f32 %v371_v49, %v236_v50  ;;  %v589_v63 = vmul.f32 %v371_v49, %v237_v51  ;;  %v592_v5 = vmul.f32 %v381_v47, %v240_v55  ;;  %v593_v6 = vmul.f32 %v381_v47, %v241_v56  ;;  %v203_v50 = vld [vmem:[%s1209_s11 + $0x58] sm:$0xff] }
  0xbe   : > { %v256_v51 = vunpack.c.l.bf16 %v202_v41  ;;  %v210_v41 = vld [vmem:[%s1209_s11 + $0x90] sm:$0xff] }
  0xc0   : > { %v386_v58 = vpop.permute.xlu1 %385  ;;  %v376_v61 = vpop.permute.xlu0 %375 }
  0xc1   : > { %v590_v0 = vmul.f32 %v376_v61, %v238_v53  ;;  %v591_v1 = vmul.f32 %v376_v61, %v239_v54  ;;  %v594_v14 = vmul.f32 %v386_v58, %v242_v59  ;;  %v595_v15 = vmul.f32 %v386_v58, %v243_v60 }
  0xc2   : > { %v258_v59 = vunpack.c.l.bf16 %v203_v50  ;;  %v259_v60 = vunpack.c.h.bf16 %v203_v50  ;;  %v211_v50 = vld [vmem:[%s1209_s11 + $0x98] sm:$0xff] }
  0xc3   : > { %v676_v7 = vadd.f32 %v590_v0, %v588_v62  ;;  %v725_v8 = vadd.f32 %v591_v1, %v589_v63 }
  0xc4   : > { %v396_v10 = vpop.permute.xlu1 %395  ;;  %v391_v13 = vpop.permute.xlu0 %390 }
  0xc5   : > { %v677_v16 = vadd.f32 %v676_v7, %v592_v5  ;;  %v726_v17 = vadd.f32 %v725_v8, %v593_v6  ;;  %v596_v21 = vmul.f32 %v391_v13, %v244_v3  ;;  %v597_v22 = vmul.f32 %v391_v13, %v245_v4 }
  0xc6   : > { %v598_v30 = vmul.f32 %v396_v10, %v246_v11  ;;  %v599_v31 = vmul.f32 %v396_v10, %v247_v12  ;;  %v260_v3 = vunpack.c.l.bf16 %v204_v57  ;;  %v261_v4 = vunpack.c.h.bf16 %v204_v57  ;;  %v212_v57 = vld [vmem:[%s1209_s11 + $0xa0] sm:$0xff] }
  0xc7   : > { %v678_v23 = vadd.f32 %v677_v16, %v594_v14  ;;  %v727_v24 = vadd.f32 %v726_v17, %v595_v15  ;;  %v262_v11 = vunpack.c.l.bf16 %v205_v2  ;;  %v263_v12 = vunpack.c.h.bf16 %v205_v2  ;;  %v213_v2 = vld [vmem:[%s1209_s11 + $0xa8] sm:$0xff] }
  0xc8   : > { %v406_v26 = vpop.permute.xlu1 %405  ;;  %v401_v29 = vpop.permute.xlu0 %400 }
  0xc9   : > { %v679_v32 = vadd.f32 %v678_v23, %v596_v21  ;;  %v728_v33 = vadd.f32 %v727_v24, %v597_v22  ;;  %v600_v37 = vmul.f32 %v401_v29, %v248_v19  ;;  %v601_v38 = vmul.f32 %v401_v29, %v249_v20 }
  0xca   : > { %v602_v46 = vmul.f32 %v406_v26, %v250_v27  ;;  %v603_v47 = vmul.f32 %v406_v26, %v251_v28  ;;  %v264_v19 = vunpack.c.l.bf16 %v206_v9  ;;  %v265_v20 = vunpack.c.h.bf16 %v206_v9  ;;  %v214_v9 = vld [vmem:[%s1209_s11 + $0xb0] sm:$0xff] }
  0xcb   : > { %v680_v39 = vadd.f32 %v679_v32, %v598_v30  ;;  %v729_v40 = vadd.f32 %v728_v33, %v599_v31  ;;  %v266_v27 = vunpack.c.l.bf16 %v207_v18  ;;  %v267_v28 = vunpack.c.h.bf16 %v207_v18  ;;  %v215_v18 = vld [vmem:[%s1209_s11 + $0xb8] sm:$0xff] }
  0xcc   : > { %v416_v42 = vpop.permute.xlu1 %415  ;;  %v411_v45 = vpop.permute.xlu0 %410 }
  0xcd   : > { %v681_v48 = vadd.f32 %v680_v39, %v600_v37  ;;  %v730_v49 = vadd.f32 %v729_v40, %v601_v38  ;;  %v604_v53 = vmul.f32 %v411_v45, %v252_v35  ;;  %v605_v54 = vmul.f32 %v411_v45, %v253_v36 }
  0xce   : > { %v606_v62 = vmul.f32 %v416_v42, %v254_v43  ;;  %v607_v63 = vmul.f32 %v416_v42, %v255_v44  ;;  %v268_v35 = vunpack.c.l.bf16 %v208_v25  ;;  %v269_v36 = vunpack.c.h.bf16 %v208_v25  ;;  %v216_v25 = vld [vmem:[%s1209_s11 + $0xc0] sm:$0xff] }
  0xcf   : > { %v682_v55 = vadd.f32 %v681_v48, %v602_v46  ;;  %v731_v56 = vadd.f32 %v730_v49, %v603_v47  ;;  %v270_v43 = vunpack.c.l.bf16 %v209_v34  ;;  %v271_v44 = vunpack.c.h.bf16 %v209_v34  ;;  %v217_v34 = vld [vmem:[%s1209_s11 + $0xc8] sm:$0xff] }
  0xd0   : > { %v426_v58 = vpop.permute.xlu1 %425  ;;  %v421_v61 = vpop.permute.xlu0 %420 }
  0xd1   : > { %v683_v0 = vadd.f32 %v682_v55, %v604_v53  ;;  %v732_v1 = vadd.f32 %v731_v56, %v605_v54  ;;  %v608_v5 = vmul.f32 %v421_v61, %v256_v51  ;;  %v609_v6 = vmul.f32 %v421_v61, %v257_v52 }
  0xd2   : > { %v610_v14 = vmul.f32 %v426_v58, %v258_v59  ;;  %v611_v15 = vmul.f32 %v426_v58, %v259_v60  ;;  %v272_v51 = vunpack.c.l.bf16 %v210_v41  ;;  %v273_v52 = vunpack.c.h.bf16 %v210_v41  ;;  %v218_v41 = vld [vmem:[%s1209_s11 + $0xd0] sm:$0xff] }
  0xd3   : > { %v684_v7 = vadd.f32 %v683_v0, %v606_v62  ;;  %v733_v8 = vadd.f32 %v732_v1, %v607_v63  ;;  %v274_v59 = vunpack.c.l.bf16 %v211_v50  ;;  %v275_v60 = vunpack.c.h.bf16 %v211_v50  ;;  %v219_v50 = vld [vmem:[%s1209_s11 + $0xd8] sm:$0xff] }
  0xd4   : > { %v436_v10 = vpop.permute.xlu1 %435  ;;  %v431_v13 = vpop.permute.xlu0 %430 }
  0xd5   : > { %v685_v16 = vadd.f32 %v684_v7, %v608_v5  ;;  %v734_v17 = vadd.f32 %v733_v8, %v609_v6  ;;  %v612_v21 = vmul.f32 %v431_v13, %v260_v3  ;;  %v613_v22 = vmul.f32 %v431_v13, %v261_v4 }
  0xd6   : > { %v614_v30 = vmul.f32 %v436_v10, %v262_v11  ;;  %v615_v31 = vmul.f32 %v436_v10, %v263_v12  ;;  %v276_v3 = vunpack.c.l.bf16 %v212_v57  ;;  %v277_v4 = vunpack.c.h.bf16 %v212_v57  ;;  %v220_v57 = vld [vmem:[%s1209_s11 + $0xe0] sm:$0xff] }
  0xd7   : > { %v686_v23 = vadd.f32 %v685_v16, %v610_v14  ;;  %v735_v24 = vadd.f32 %v734_v17, %v611_v15  ;;  %v278_v11 = vunpack.c.l.bf16 %v213_v2  ;;  %v279_v12 = vunpack.c.h.bf16 %v213_v2  ;;  %v221_v2 = vld [vmem:[%s1209_s11 + $0xe8] sm:$0xff] }
  0xd8   : > { %v446_v26 = vpop.permute.xlu1 %445  ;;  %v441_v29 = vpop.permute.xlu0 %440 }
  0xd9   : > { %v687_v32 = vadd.f32 %v686_v23, %v612_v21  ;;  %v736_v33 = vadd.f32 %v735_v24, %v613_v22  ;;  %v616_v37 = vmul.f32 %v441_v29, %v264_v19  ;;  %v617_v38 = vmul.f32 %v441_v29, %v265_v20 }
  0xda   : > { %v618_v46 = vmul.f32 %v446_v26, %v266_v27  ;;  %v619_v47 = vmul.f32 %v446_v26, %v267_v28  ;;  %v280_v19 = vunpack.c.l.bf16 %v214_v9  ;;  %v281_v20 = vunpack.c.h.bf16 %v214_v9  ;;  %v222_v9 = vld [vmem:[%s1209_s11 + $0xf0] sm:$0xff] }
  0xdb   : > { %v688_v39 = vadd.f32 %v687_v32, %v614_v30  ;;  %v737_v40 = vadd.f32 %v736_v33, %v615_v31  ;;  %v282_v27 = vunpack.c.l.bf16 %v215_v18  ;;  %v283_v28 = vunpack.c.h.bf16 %v215_v18  ;;  %v223_v18 = vld [vmem:[%s1209_s11 + $0xf8] sm:$0xff] }
  0xdc   : > { %v456_v42 = vpop.permute.xlu1 %455  ;;  %v451_v45 = vpop.permute.xlu0 %450 }
  0xdd   : > { %v689_v48 = vadd.f32 %v688_v39, %v616_v37  ;;  %v738_v49 = vadd.f32 %v737_v40, %v617_v38  ;;  %v620_v53 = vmul.f32 %v451_v45, %v268_v35  ;;  %v621_v54 = vmul.f32 %v451_v45, %v269_v36 }
  0xde   : > { %v622_v62 = vmul.f32 %v456_v42, %v270_v43  ;;  %v623_v63 = vmul.f32 %v456_v42, %v271_v44  ;;  %v284_v35 = vunpack.c.l.bf16 %v216_v25  ;;  %v285_v36 = vunpack.c.h.bf16 %v216_v25  ;;  %v224_v25 = vld [vmem:[%s1209_s11 + $0x100] sm:$0xff] }
  0xdf   : > { %v690_v55 = vadd.f32 %v689_v48, %v618_v46  ;;  %v739_v56 = vadd.f32 %v738_v49, %v619_v47  ;;  %v286_v43 = vunpack.c.l.bf16 %v217_v34  ;;  %v287_v44 = vunpack.c.h.bf16 %v217_v34  ;;  %v225_v34 = vld [vmem:[%s1209_s11 + $0x108] sm:$0xff] }
  0xe0   : > { %v466_v58 = vpop.permute.xlu1 %465  ;;  %v461_v61 = vpop.permute.xlu0 %460 }
  0xe1   : > { %v691_v0 = vadd.f32 %v690_v55, %v620_v53  ;;  %v740_v1 = vadd.f32 %v739_v56, %v621_v54  ;;  %v624_v5 = vmul.f32 %v461_v61, %v272_v51  ;;  %v625_v6 = vmul.f32 %v461_v61, %v273_v52 }
  0xe2   : > { %v626_v14 = vmul.f32 %v466_v58, %v274_v59  ;;  %v627_v15 = vmul.f32 %v466_v58, %v275_v60  ;;  %v288_v51 = vunpack.c.l.bf16 %v218_v41  ;;  %v289_v52 = vunpack.c.h.bf16 %v218_v41  ;;  %v226_v41 = vld [vmem:[%s1209_s11 + $0x110] sm:$0xff] }
  0xe3   : > { %v692_v7 = vadd.f32 %v691_v0, %v622_v62  ;;  %v741_v8 = vadd.f32 %v740_v1, %v623_v63  ;;  %v290_v59 = vunpack.c.l.bf16 %v219_v50  ;;  %v291_v60 = vunpack.c.h.bf16 %v219_v50  ;;  %v227_v50 = vld [vmem:[%s1209_s11 + $0x118] sm:$0xff] }
  0xe4   : > { %v476_v10 = vpop.permute.xlu1 %475  ;;  %v471_v13 = vpop.permute.xlu0 %470 }
  0xe5   : > { %v693_v16 = vadd.f32 %v692_v7, %v624_v5  ;;  %v742_v17 = vadd.f32 %v741_v8, %v625_v6  ;;  %v628_v21 = vmul.f32 %v471_v13, %v276_v3  ;;  %v629_v22 = vmul.f32 %v471_v13, %v277_v4 }
  0xe6   : > { %v630_v30 = vmul.f32 %v476_v10, %v278_v11  ;;  %v631_v31 = vmul.f32 %v476_v10, %v279_v12  ;;  %v292_v3 = vunpack.c.l.bf16 %v220_v57  ;;  %v293_v4 = vunpack.c.h.bf16 %v220_v57  ;;  %v228_v57 = vld [vmem:[%s1209_s11 + $0x120] sm:$0xff] }
  0xe7   : > { %v694_v23 = vadd.f32 %v693_v16, %v626_v14  ;;  %v743_v24 = vadd.f32 %v742_v17, %v627_v15  ;;  %v294_v11 = vunpack.c.l.bf16 %v221_v2  ;;  %v295_v12 = vunpack.c.h.bf16 %v221_v2  ;;  %v229_v2 = vld [vmem:[%s1209_s11 + $0x128] sm:$0xff] }
  0xe8   : > { %v486_v26 = vpop.permute.xlu1 %485  ;;  %v481_v29 = vpop.permute.xlu0 %480 }
  0xe9   : > { %v695_v32 = vadd.f32 %v694_v23, %v628_v21  ;;  %v744_v33 = vadd.f32 %v743_v24, %v629_v22  ;;  %v632_v37 = vmul.f32 %v481_v29, %v280_v19  ;;  %v633_v38 = vmul.f32 %v481_v29, %v281_v20 }
  0xea   : > { %v634_v46 = vmul.f32 %v486_v26, %v282_v27  ;;  %v635_v47 = vmul.f32 %v486_v26, %v283_v28  ;;  %v296_v19 = vunpack.c.l.bf16 %v222_v9  ;;  %v297_v20 = vunpack.c.h.bf16 %v222_v9  ;;  %v230_v9 = vld [vmem:[%s1209_s11 + $0x130] sm:$0xff] }
  0xeb   : > { %v696_v39 = vadd.f32 %v695_v32, %v630_v30  ;;  %v745_v40 = vadd.f32 %v744_v33, %v631_v31  ;;  %v298_v27 = vunpack.c.l.bf16 %v223_v18  ;;  %v299_v28 = vunpack.c.h.bf16 %v223_v18  ;;  %v231_v18 = vld [vmem:[%s1209_s11 + $0x138] sm:$0xff] }
  0xec   : > { %v496_v42 = vpop.permute.xlu1 %495  ;;  %v491_v45 = vpop.permute.xlu0 %490 }
  0xed   : > { %v697_v48 = vadd.f32 %v696_v39, %v632_v37  ;;  %v746_v49 = vadd.f32 %v745_v40, %v633_v38  ;;  %v636_v53 = vmul.f32 %v491_v45, %v284_v35  ;;  %v637_v54 = vmul.f32 %v491_v45, %v285_v36 }
  0xee   : > { %v638_v62 = vmul.f32 %v496_v42, %v286_v43  ;;  %v639_v63 = vmul.f32 %v496_v42, %v287_v44  ;;  %v300_v35 = vunpack.c.l.bf16 %v224_v25  ;;  %v301_v36 = vunpack.c.h.bf16 %v224_v25  ;;  %v232_v25 = vld [vmem:[%s1209_s11 + $0x140] sm:$0xff] }
  0xef   : > { %v698_v55 = vadd.f32 %v697_v48, %v634_v46  ;;  %v747_v56 = vadd.f32 %v746_v49, %v635_v47  ;;  %v302_v43 = vunpack.c.l.bf16 %v225_v34  ;;  %v303_v44 = vunpack.c.h.bf16 %v225_v34  ;;  %v233_v34 = vld [vmem:[%s1209_s11 + $0x148] sm:$0xff] }
  0xf0   : > { %v506_v58 = vpop.permute.xlu1 %505  ;;  %v501_v61 = vpop.permute.xlu0 %500 }
  0xf1   : > { %v699_v0 = vadd.f32 %v698_v55, %v636_v53  ;;  %v748_v1 = vadd.f32 %v747_v56, %v637_v54  ;;  %v640_v5 = vmul.f32 %v501_v61, %v288_v51  ;;  %v641_v6 = vmul.f32 %v501_v61, %v289_v52 }
  0xf2   : > { %v642_v14 = vmul.f32 %v506_v58, %v290_v59  ;;  %v643_v15 = vmul.f32 %v506_v58, %v291_v60  ;;  %v304_v51 = vunpack.c.l.bf16 %v226_v41  ;;  %v305_v52 = vunpack.c.h.bf16 %v226_v41  ;;  %v234_v41 = vld [vmem:[%s1209_s11 + $0x150] sm:$0xff] }
  0xf3   : > { %v700_v7 = vadd.f32 %v699_v0, %v638_v62  ;;  %v749_v8 = vadd.f32 %v748_v1, %v639_v63  ;;  %v306_v59 = vunpack.c.l.bf16 %v227_v50  ;;  %v307_v60 = vunpack.c.h.bf16 %v227_v50  ;;  %v235_v50 = vld [vmem:[%s1209_s11 + $0x158] sm:$0xff]  ;;  %s774_s11 = sld [smem:[#allocation2]] }
  0xf4   : > { %v516_v10 = vpop.permute.xlu1 %515  ;;  %v511_v13 = vpop.permute.xlu0 %510 }
  0xf5   : > { %v701_v16 = vadd.f32 %v700_v7, %v640_v5  ;;  %v750_v17 = vadd.f32 %v749_v8, %v641_v6  ;;  %v644_v21 = vmul.f32 %v511_v13, %v292_v3  ;;  %v645_v22 = vmul.f32 %v511_v13, %v293_v4 }
  0xf6   : > { %v646_v30 = vmul.f32 %v516_v10, %v294_v11  ;;  %v647_v31 = vmul.f32 %v516_v10, %v295_v12  ;;  %v308_v3 = vunpack.c.l.bf16 %v228_v57  ;;  %v309_v4 = vunpack.c.h.bf16 %v228_v57 }
  0xf7   : > { %v702_v23 = vadd.f32 %v701_v16, %v642_v14  ;;  %v751_v24 = vadd.f32 %v750_v17, %v643_v15  ;;  %v310_v11 = vunpack.c.l.bf16 %v229_v2  ;;  %v311_v12 = vunpack.c.h.bf16 %v229_v2 }
  0xf8   : > { %v526_v26 = vpop.permute.xlu1 %525  ;;  %v521_v29 = vpop.permute.xlu0 %520  ;;  %v322_v57 = vunpack.c.l.bf16 %v235_v50 }
  0xf9   : > { %v703_v32 = vadd.f32 %v702_v23, %v644_v21  ;;  %v752_v33 = vadd.f32 %v751_v24, %v645_v22  ;;  %v648_v37 = vmul.f32 %v521_v29, %v296_v19  ;;  %v649_v38 = vmul.f32 %v521_v29, %v297_v20 }
  0xfa   : > { %v650_v46 = vmul.f32 %v526_v26, %v298_v27  ;;  %v651_v47 = vmul.f32 %v526_v26, %v299_v28  ;;  %v312_v19 = vunpack.c.l.bf16 %v230_v9  ;;  %v313_v20 = vunpack.c.h.bf16 %v230_v9 }
  0xfb   : > { %v704_v39 = vadd.f32 %v703_v32, %v646_v30  ;;  %v753_v40 = vadd.f32 %v752_v33, %v647_v31  ;;  %v314_v27 = vunpack.c.l.bf16 %v231_v18  ;;  %v315_v28 = vunpack.c.h.bf16 %v231_v18 }
  0xfc   : > { %v536_v42 = vpop.permute.xlu1 %535  ;;  %v531_v45 = vpop.permute.xlu0 %530 }
  0xfd   : > { %v705_v48 = vadd.f32 %v704_v39, %v648_v37  ;;  %v754_v49 = vadd.f32 %v753_v40, %v649_v38  ;;  %v652_v53 = vmul.f32 %v531_v45, %v300_v35  ;;  %v653_v54 = vmul.f32 %v531_v45, %v301_v36 }
  0xfe   : > { %v654_v62 = vmul.f32 %v536_v42, %v302_v43  ;;  %v655_v63 = vmul.f32 %v536_v42, %v303_v44  ;;  %v316_v35 = vunpack.c.l.bf16 %v232_v25  ;;  %v317_v36 = vunpack.c.h.bf16 %v232_v25 }
  0xff   : > { %v706_v55 = vadd.f32 %v705_v48, %v650_v46  ;;  %v755_v56 = vadd.f32 %v754_v49, %v651_v47  ;;  %v318_v43 = vunpack.c.l.bf16 %v233_v34  ;;  %v319_v44 = vunpack.c.h.bf16 %v233_v34 }
 0x100   : > { %v546_v58 = vpop.permute.xlu1 %545  ;;  %v541_v61 = vpop.permute.xlu0 %540  ;;  %v796_v34 = vlaneseq }
 0x101   : > { %v707_v0 = vadd.f32 %v706_v55, %v652_v53  ;;  %v756_v1 = vadd.f32 %v755_v56, %v653_v54  ;;  %v656_v5 = vmul.f32 %v541_v61, %v304_v51  ;;  %v657_v6 = vmul.f32 %v541_v61, %v305_v52 }
 0x102   : > { %v658_v14 = vmul.f32 %v546_v58, %v306_v59  ;;  %v659_v15 = vmul.f32 %v546_v58, %v307_v60  ;;  %v320_v51 = vunpack.c.l.bf16 %v234_v41  ;;  %v321_v52 = vunpack.c.h.bf16 %v234_v41 }
 0x103   : > { %v708_v7 = vadd.f32 %v707_v0, %v654_v62  ;;  %v757_v8 = vadd.f32 %v756_v1, %v655_v63  ;;  %v323_v58 = vunpack.c.h.bf16 %v235_v50  ;;  %vm810_vm0 = vcmp.lt.s32.totalorder %v796_v34, 256 }
 0x104   : > { %v556_v10 = vpop.permute.xlu1 %555  ;;  %v551_v13 = vpop.permute.xlu0 %550 }
 0x105   : > { %v709_v16 = vadd.f32 %v708_v7, %v656_v5  ;;  %v758_v17 = vadd.f32 %v757_v8, %v657_v6  ;;  %v660_v21 = vmul.f32 %v551_v13, %v308_v3  ;;  %v661_v22 = vmul.f32 %v551_v13, %v309_v4 }
 0x106   : > { %v662_v30 = vmul.f32 %v556_v10, %v310_v11  ;;  %v663_v31 = vmul.f32 %v556_v10, %v311_v12 }
 0x107   : > { %v710_v23 = vadd.f32 %v709_v16, %v658_v14  ;;  %v759_v24 = vadd.f32 %v758_v17, %v659_v15 }
 0x108   : > { %v566_v26 = vpop.permute.xlu1 %565  ;;  %v561_v29 = vpop.permute.xlu0 %560 }
 0x109   : > { %v711_v32 = vadd.f32 %v710_v23, %v660_v21  ;;  %v760_v33 = vadd.f32 %v759_v24, %v661_v22  ;;  %v664_v37 = vmul.f32 %v561_v29, %v312_v19  ;;  %v665_v38 = vmul.f32 %v561_v29, %v313_v20 }
 0x10a   : > { %v666_v46 = vmul.f32 %v566_v26, %v314_v27  ;;  %v667_v47 = vmul.f32 %v566_v26, %v315_v28  ;;  %v775_v21 = vstv %s774_s11 }
 0x10b   : > { %v712_v39 = vadd.f32 %v711_v32, %v662_v30  ;;  %v761_v40 = vadd.f32 %v760_v33, %v663_v31  ;;  %v1080_v32 = vmov 1966171168  }
 0x10c   : > { %v576_v42 = vpop.permute.xlu1 %575  ;;  %v571_v45 = vpop.permute.xlu0 %570  ;;  %v794_v33 = vunpack.c.l.s4 %v1080_v32 }
 0x10d   : > { %v713_v48 = vadd.f32 %v712_v39, %v664_v37  ;;  %v762_v49 = vadd.f32 %v761_v40, %v665_v38  ;;  %v668_v53 = vmul.f32 %v571_v45, %v316_v35  ;;  %v669_v54 = vmul.f32 %v571_v45, %v317_v36 }
 0x10e   : > { %v670_v60 = vmul.f32 %v576_v42, %v318_v43  ;;  %v671_v61 = vmul.f32 %v576_v42, %v319_v44  ;;  %v795_v35 = vunpack.c.0.s8 %v794_v33  ;;  %v797_v36 = vshrl.u32 %v796_v34, 7 }
 0x10f   : > { %v714_v55 = vadd.f32 %v713_v48, %v666_v46  ;;  %v763_v56 = vadd.f32 %v762_v49, %v667_v47 }
 0x110   : > { %v581_v59 = vpop.permute.xlu0 %580  ;;  %v586_v0 = vpop.permute.xlu1 %585  ;;  %v798_v38 = vsub.s32 %v795_v35, %v797_v36 }
 0x111   : > { %v715_v62 = vadd.f32 %v714_v55, %v668_v53  ;;  %v764_v63 = vadd.f32 %v763_v56, %v669_v54  ;;  %v672_v1 = vmul.f32 %v581_v59, %v320_v51  ;;  %v673_v2 = vmul.f32 %v581_v59, %v321_v52 }
 0x112   : > { %v674_v5 = vmul.f32 %v586_v0, %v322_v57  ;;  %v675_v6 = vmul.f32 %v586_v0, %v323_v58 }
 0x113   : > { %v716_v3 = vadd.f32 %v715_v62, %v670_v60  ;;  %v765_v4 = vadd.f32 %v764_v63, %v671_v61 }
 0x115   : > { %v717_v7 = vadd.f32 %v716_v3, %v672_v1  ;;  %v766_v8 = vadd.f32 %v765_v4, %v673_v2 }
 0x117   : > { %v718_v9 = vadd.f32 %v717_v7, %v674_v5  ;;  %v767_v10 = vadd.f32 %v766_v8, %v675_v6 }
 0x119   : > { %v719_v11 = vrot.slane %v718_v9, 4  ;;  %v768_v12 = vrot.slane %v767_v10, 4 }
 0x11b   : > { %v720_v13 = vadd.f32 %v719_v11, %v718_v9  ;;  %v769_v14 = vadd.f32 %v768_v12, %v767_v10 }
 0x11d   : > { %v721_v15 = vrot.slane %v720_v13, 2  ;;  %v770_v16 = vrot.slane %v769_v14, 2 }
 0x11f   : > { %v722_v17 = vadd.f32 %v721_v15, %v720_v13  ;;  %v771_v18 = vadd.f32 %v770_v16, %v769_v14 }
 0x121   : > { %v723_v19 = vrot.slane %v722_v17, 1  ;;  %v772_v20 = vrot.slane %v771_v18, 1 }
 0x123   : > { %v724_v22 = vadd.f32 %v723_v19, %v722_v17  ;;  %v773_v23 = vadd.f32 %v772_v20, %v771_v18 }
 0x125   : > { %v776_v24 = vadd.f32 %v775_v21, %v724_v22  ;;  %v777_v25 = vadd.f32 %v775_v21, %v773_v23 }
 0x127   : > { %v905_v26 = vmul.f32 -1.442695, %v776_v24  ;;  %v906_v27 = vmul.f32 -1.442695, %v777_v25 }
 0x129   : > { %969 = vpow2.f32 %v905_v26 }
 0x12a   : > { %971 = vpow2.f32 %v906_v27 }
 0x133   : > { %v970_v28 = vpop.eup %969 }
 0x134   : > { %v972_v29 = vpop.eup %971  ;;  %v784_v30 = vadd.f32 1.0, %v970_v28 }
 0x135   : > { %v785_v31 = vadd.f32 1.0, %v972_v29 }
 0x136   : > { %973 = vrcp.f32 %v784_v30 }
 0x137   : > { %975 = vrcp.f32 %v785_v31 }
 0x140   : > { %v974_v37 = vpop.eup %973 }
 0x141   : > { %v976_v39 = vpop.eup %975 }
 0x142   : > { %v792_v40 = vcombine.low %v974_v37, %v976_v39 }
 0x144   : > { %v799_v41 = vrot.slane %v792_v40, %v798_v38 }
 0x146   : > { %v806_v42 = vrot.slane %v799_v41, %v798_v38 }
 0x148   : > { %812 = vst.msk [vmem:[%s189_s13] sm:$0x3] %vm810_vm0, %v806_v42 }
 0x149   : > { %1020 = shalt.err (!%p1017_p3)
}
 0x14a   : > { %s1021_s6 = scalar_lea.hbm %s1396_s21, 32  ;;  %s1025_s10 = scalar_lea.hbm %s1443_s3, 64 }
 0x14b   : > { %p1022_p5 = scmp.ne.s32.totalorder %s1396_s21, %s1021_s6  ;;  %p1026_p9 = scmp.lt.u32.totalorder %s1396_s21, %s1443_s3 }
 0x14c   : > { %p1027_p0 = scmp.lt.u32.totalorder %s1025_s10, %s1021_s6  ;;  %p1029_p6 = scmp.lt.u32.totalorder %s1021_s6, %s1396_s21 }
 0x14d   : > { %p1023_p7 = pnand %p1022_p5, %p1450_p11 }
 0x14e   : > { %p1028_p2 = por %p1027_p0, %p1026_p9 }
 0x14f   : > { %p1024_p8 = pneg %p1023_p7 }
 0x150   : > { %p1030_p12 = por %p1029_p6, %p1028_p2 }
 0x152   : > { %p1031_p13 = pnand %p1030_p12, %p1024_p8 }
 0x154   : > { %1034 = shalt.err (!%p1031_p13)
}
 0x155   : > { %918 = dma.vmem_to_hbm [thread:$0]  (%p1450_p11), %s1398_s18, 32, %s1396_s21, %s814_s26  }
 0x156 PF: > { %s840_s7 = sand.u32 1, %s1061_s14   ;;  %p1451_p4 = scmp.ne.s32.totalorder %s1447_s25, 0 }
 0x157   : > { %p1452_p10 = scmp.ge.s32.totalorder %s1073_s17, 2  ;;  %s841_s11 = scalar_lea.sflag [#allocation5], %s840_s7 }
 0x159   : > { %p925_p1 = pnand %p1452_p10, %p1451_p4 }
 0x15b   : > { %1056 = dma.done.wait (!%p925_p1), %s841_s11, 32  }
 0x15c   : > { %1058 = vsyncadd (!%p925_p1), %s841_s11, 4294967264  ;;  %p17_p3 = scmp.ge.s32.totalorder %s1130_s19, 4   ;;  %s1453_s14 = smov %s1065_s15 }
 0x15d   : > { %s1454_s15 = smov %s1069_s16  ;;  %s1455_s16 = smov %s1142_s22 }
 0x15e   : > { %s1456_s17 = smov %s1130_s19  ;;  %19 = sbr.rel (!%p17_p3) target bundleno = 7 (0x7), region = 77 }
 0x165   :  { %846 = vsyncpa [#allocation4], 1 }
 0x166   :  { %848 = vsyncpa [#allocation4 + $0x1], 1 }
 0x167   :  { %849 = vsyncpa [#allocation5], 1 }
 0x168   :  { %851 = vsyncpa [#allocation5 + $0x1], 1 }

</bundles_post_ra>
